<compile_context>
chip_gen: v7x
topology: tpu7x:2x2x1
jax: 0.10.0
libtpu: 0.0.40
codegen_flags: <defaults>
</compile_context>

<pallas_src>
import jax
import jax.numpy as jnp
from jax import lax
from jax.experimental import pallas as pl
from jax.experimental.pallas import tpu as pltpu

KH = KW = 3
EPS = 1e-5
COUT_PAD = 8          # pad output-channel rows to the native 8-sublane tile


def _fused_kernel(p_ref, w_ref, prm_ref, o_ref):
    # p_ref:   (K, S)        im2col patches, K = Cin*KH*KW, S = N*Hout*Wout (lanes)
    # w_ref:   (COUT_PAD, K) conv weights (rows >= Cout are zero)
    # prm_ref: (COUT_PAD, 3) columns = [conv bias, bn gamma, bn beta] (padded rows zero)
    # o_ref:   (COUT_PAD, S) lane-dense, sublane-full output
    S = p_ref.shape[1]

    # ---- Conv2d as a single MXU matmul: (8, K) @ (K, S) -> (8, S) ----
    acc = jnp.dot(w_ref[...], p_ref[...], preferred_element_type=jnp.float32)
    acc = acc + prm_ref[:, 0:1]                         # conv bias, lane-broadcast

    # ---- clamp(-1, 1) ----
    v = jnp.clip(acc, -1.0, 1.0)

    # ---- BatchNorm2d, training mode: single-pass biased batch stats per channel.
    # (E[x^2]-mean^2 is numerically safe here only because v is clamped to [-1, 1].)
    inv_cnt = 1.0 / S
    s1 = jnp.sum(v, axis=1, keepdims=True)              # (8, 1)
    s2 = jnp.sum(v * v, axis=1, keepdims=True)          # (8, 1)
    mean = s1 * inv_cnt
    var = jnp.maximum(s2 * inv_cnt - mean * mean, 0.0)
    scale = prm_ref[:, 1:2] * lax.rsqrt(var + EPS)      # gamma * invstd   (EUP rsqrt)
    shift = prm_ref[:, 2:3] - mean * scale              # beta - mean*scale

    # ---- normalize + ReLU, unmasked lane-dense store ----
    o_ref[...] = jnp.maximum(v * scale + shift, 0.0).astype(o_ref.dtype)


def fused_conv_clamp_bn_relu(x_nchw, w_oihw, bias, gamma, beta):
    """x_nchw: (N, Cin, H, W) float32.  Returns (N, Cout, Hout, Wout) float32."""
    N, Cin, H, W = x_nchw.shape
    Cout = w_oihw.shape[0]
    Hout, Wout = H - KH + 1, W - KW + 1
    S = N * Hout * Wout
    K = Cin * KH * KW

    # im2col in the wrapper; allow_input_fusion=[True, ...] lets XLA fuse this
    # slice/transpose/reshape producer straight into the pallas_call operand rather
    # than round-tripping the 58 KB patch matrix through HBM.
    # row index = cin*KH*KW + kh*KW + kw  (matches w.reshape(Cout, K) row order)
    # col index = n*Hout*Wout + oh*Wout + ow
    taps = jnp.stack(
        [x_nchw[:, :, kh:kh + Hout, kw:kw + Wout]
         for kh in range(KH) for kw in range(KW)],
        axis=2)                                          # (N, Cin, KH*KW, Hout, Wout)
    patches = taps.transpose(1, 2, 0, 3, 4).reshape(K, S).astype(jnp.float32)

    # Zero-pad channel rows 5 -> 8 (unmasked sublane tile); padded rows stay zero
    # end-to-end: w=0 -> acc=0 -> clamp=0 -> mean/var=0 -> gamma=0 -> output 0.
    w_mat = jnp.zeros((COUT_PAD, K), jnp.float32).at[:Cout].set(
        w_oihw.reshape(Cout, K).astype(jnp.float32))
    params = jnp.zeros((COUT_PAD, 3), jnp.float32).at[:Cout].set(
        jnp.stack([bias, gamma, beta], axis=1).astype(jnp.float32))

    vmem = pltpu.MemorySpace.VMEM
    cost = pl.CostEstimate(
        flops=2 * COUT_PAD * K * S,
        bytes_accessed=4 * (K * S + COUT_PAD * K + 3 * COUT_PAD + COUT_PAD * S),
        transcendentals=0)

    y2d = pl.pallas_call(
        _fused_kernel,
        out_shape=jax.ShapeDtypeStruct((COUT_PAD, S), jnp.float32),
        in_specs=[pl.BlockSpec(memory_space=vmem)] * 3,
        out_specs=pl.BlockSpec(memory_space=vmem),
        cost_estimate=cost,
        compiler_params=pltpu.CompilerParams(
            allow_input_fusion=[True, False, False]),
    )(patches, w_mat, params)

    # Drop padded rows and restore NCHW.  For N=1 the transpose is metadata-only; for
    # N>1, either reorder the im2col columns or let the consumer take (Cout, N*HW).
    return y2d[:Cout].reshape(Cout, N, Hout, Wout).transpose(1, 0, 2, 3)


def _reference(x_nchw, w_oihw, bias, gamma, beta):
    """Plain-JAX reference mirroring the PyTorch forward (training-mode BN)."""
    v1 = lax.conv_general_dilated(
        x_nchw, w_oihw, window_strides=(1, 1), padding="VALID",
        dimension_numbers=("NCHW", "OIHW", "NCHW"))
    v1 = v1 + bias.reshape(1, -1, 1, 1)
    v2 = jnp.clip(v1, -1.0, 1.0)
    mean = jnp.mean(v2, axis=(0, 2, 3), keepdims=True)
    var = jnp.mean((v2 - mean) ** 2, axis=(0, 2, 3), keepdims=True)
    v3 = (v2 - mean) * lax.rsqrt(var + EPS)
    v3 = v3 * gamma.reshape(1, -1, 1, 1) + beta.reshape(1, -1, 1, 1)
    return jnp.maximum(v3, 0.0)


if __name__ == "__main__":
    key = jax.random.PRNGKey(0)
    k_x, k_w, k_b = jax.random.split(key, 3)

    N, Cin, H, W = 1, 5, 20, 20        # shapes implied by the PyTorch module
    Cout = 5

    x = jax.random.normal(k_x, (N, Cin, H, W), dtype=jnp.float32)

    # Deterministic parameter init (shapes from nn.Conv2d(5,5,3) / nn.BatchNorm2d(5)).
    fan_in = Cin * KH * KW
    bound = 1.0 / (fan_in ** 0.5)
    w = jax.random.uniform(k_w, (Cout, Cin, KH, KW), jnp.float32, -bound, bound)
    b = jax.random.uniform(k_b, (Cout,), jnp.float32, -bound, bound)
    gamma = jnp.ones((Cout,), jnp.float32)   # BN weight at init
    beta = jnp.zeros((Cout,), jnp.float32)   # BN bias at init
    # TODO(synk): BN running-stat updates (module state) are not modeled; training-mode
    # forward output depends only on batch statistics, which are computed in-kernel.

    fused = jax.jit(fused_conv_clamp_bn_relu)
    out = fused(x, w, b, gamma, beta)
    out = jax.block_until_ready(out)

    ref = _reference(x, w, b, gamma, beta)
    assert out.shape == (N, Cout, H - 2, W - 2), out.shape
    assert jnp.max(jnp.abs(out - ref)) < 1e-4, float(jnp.max(jnp.abs(out - ref)))

    print("KERNEL_OK")
</pallas_src>

<mosaic_0001>
module attributes {stable_mosaic.version = 11 : i64} {
  func.func @_fused_kernel(%arg0: memref<45x324xf32, #tpu.memory_space<vmem>>, %arg1: memref<8x45xf32, #tpu.memory_space<vmem>>, %arg2: memref<8x3xf32, #tpu.memory_space<vmem>>, %arg3: memref<8x324xf32, #tpu.memory_space<vmem>>) attributes {dimension_semantics = [], scalar_prefetch = 0 : i64, scratch_operands = 0 : i64, tpu.core_type = #tpu.core_type<tc>} {
    %c0 = arith.constant 0 : index
    %c0_0 = arith.constant 0 : index
    %0 = vector.load %arg1[%c0, %c0_0] : memref<8x45xf32, #tpu.memory_space<vmem>>, vector<8x45xf32>
    %c0_1 = arith.constant 0 : index
    %c0_2 = arith.constant 0 : index
    %1 = vector.load %arg0[%c0_1, %c0_2] : memref<45x324xf32, #tpu.memory_space<vmem>>, vector<45x324xf32>
    %cst = arith.constant dense<0.000000e+00> : vector<8x324xf32>
    %2 = tpu.matmul %0, %1, %cst {dimension_numbers = #tpu.dot_dimension_numbers<[1], [0], [0], [1], [0, 0, 1, 1], [], []>} : vector<8x45xf32>, vector<45x324xf32>, vector<8x324xf32> -> vector<8x324xf32>
    %c0_3 = arith.constant 0 : index
    %c0_4 = arith.constant 0 : index
    %3 = vector.load %arg2[%c0_3, %c0_4] : memref<8x3xf32, #tpu.memory_space<vmem>>, vector<8x1xf32>
    %4 = vector.broadcast %3 : vector<8x1xf32> to vector<8x324xf32>
    %5 = arith.addf %2, %4 : vector<8x324xf32>
    %cst_5 = arith.constant -1.000000e+00 : f32
    %cst_6 = arith.constant 1.000000e+00 : f32
    %6 = vector.broadcast %cst_5 : f32 to vector<8x324xf32>
    %7 = arith.maximumf %6, %5 : vector<8x324xf32>
    %8 = vector.broadcast %cst_6 : f32 to vector<8x324xf32>
    %9 = arith.minimumf %8, %7 : vector<8x324xf32>
    %cst_7 = arith.constant dense<0.000000e+00> : vector<8xf32>
    %10 = vector.multi_reduction <add>, %9, %cst_7 [1] : vector<8x324xf32> to vector<8xf32>
    %11 = vector.shape_cast %10 : vector<8xf32> to vector<8x1xf32>
    %12 = arith.mulf %9, %9 : vector<8x324xf32>
    %cst_8 = arith.constant dense<0.000000e+00> : vector<8xf32>
    %13 = vector.multi_reduction <add>, %12, %cst_8 [1] : vector<8x324xf32> to vector<8xf32>
    %14 = vector.shape_cast %13 : vector<8xf32> to vector<8x1xf32>
    %cst_9 = arith.constant 0.00308641978 : f32
    %15 = vector.broadcast %cst_9 : f32 to vector<8x1xf32>
    %16 = arith.mulf %11, %15 : vector<8x1xf32>
    %cst_10 = arith.constant 0.00308641978 : f32
    %17 = vector.broadcast %cst_10 : f32 to vector<8x1xf32>
    %18 = arith.mulf %14, %17 : vector<8x1xf32>
    %19 = arith.mulf %16, %16 : vector<8x1xf32>
    %20 = arith.subf %18, %19 : vector<8x1xf32>
    %cst_11 = arith.constant 0.000000e+00 : f32
    %21 = vector.broadcast %cst_11 : f32 to vector<8x1xf32>
    %22 = arith.maximumf %20, %21 : vector<8x1xf32>
    %c0_12 = arith.constant 0 : index
    %c1 = arith.constant 1 : index
    %23 = vector.load %arg2[%c0_12, %c1] : memref<8x3xf32, #tpu.memory_space<vmem>>, vector<8x1xf32>
    %cst_13 = arith.constant 9.99999974E-6 : f32
    %24 = vector.broadcast %cst_13 : f32 to vector<8x1xf32>
    %25 = arith.addf %22, %24 : vector<8x1xf32>
    %26 = math.rsqrt %25 : vector<8x1xf32>
    %27 = arith.mulf %23, %26 : vector<8x1xf32>
    %c0_14 = arith.constant 0 : index
    %c2 = arith.constant 2 : index
    %28 = vector.load %arg2[%c0_14, %c2] : memref<8x3xf32, #tpu.memory_space<vmem>>, vector<8x1xf32>
    %29 = arith.mulf %16, %27 : vector<8x1xf32>
    %30 = arith.subf %28, %29 : vector<8x1xf32>
    %31 = vector.broadcast %27 : vector<8x1xf32> to vector<8x324xf32>
    %32 = arith.mulf %9, %31 : vector<8x324xf32>
    %33 = vector.broadcast %30 : vector<8x1xf32> to vector<8x324xf32>
    %34 = arith.addf %32, %33 : vector<8x324xf32>
    %cst_15 = arith.constant 0.000000e+00 : f32
    %35 = vector.broadcast %cst_15 : f32 to vector<8x324xf32>
    %36 = arith.maximumf %34, %35 : vector<8x324xf32>
    %c0_16 = arith.constant 0 : index
    %c0_17 = arith.constant 0 : index
    %37 = vector.load %arg3[%c0_16, %c0_17] : memref<8x324xf32, #tpu.memory_space<vmem>>, vector<8x324xf32>
    tpu.vector_store %arg3[%c0_16, %c0_17], %36 {strides = array<i32>} : memref<8x324xf32, #tpu.memory_space<vmem>>, vector<8x324xf32>,
    return
  }
}

</mosaic_0001>

<bundles_post_ra>
// kernel: fused_conv_clamp_bn_relu.1
= control target key start
LH: loop header
LB: loop body
LE: loop exit
PB: predicated region body
PF: predicated region fallthrough
CT: control target
= control target key end

     0   :  { %v322_v3 = vmov 0.0|0.0   ;;  %v323_v4 = vmov 0.0   ;;  %vm324_vm0 = vmmov 0   ;;  %v325_v9 = vmov 0   ;;  %s423_s0 = inlined_call_operand.vmem [shape: f32[45,324], index: 0, kind: input, shape index: {}]   ;;  %s424_s2 = inlined_call_operand.vmem [shape: f32[8,3], index: 2, kind: input, shape index: {}]   ;;  %s425_s1 = inlined_call_operand.vmem [shape: f32[8,45], index: 1, kind: input, shape index: {}]   ;;  %s426_s3 = inlined_call_operand.vmem [shape: f32[8,324], index: 3, kind: output, shape index: {}]  }
   0x1   :  { %v16_v0 = vld [vmem:[%s423_s0 + $0x8] sm:$0xff]  ;;  %v19_v1 = vld [vmem:[%s423_s0 + $0x20] sm:$0xff]  ;;  %298 = vmatprep.subr.bf16.mxu1 %v322_v3  ;;  %117 = vmatprep.mubr.f32.mxu0 %v323_v4  ;;  %v18_v6 = vld [vmem:[%s423_s0 + $0x18] sm:$0xff]  ;;  %vm43_vm1 = vcmask 1044480   ;;  %vm326_vm2 = vmmov 1   ;;  %vm39_vm4 = vcmask 367616  }
   0x2   :  { %v15_v2 = vld [vmem:[%s423_s0] sm:$0xff]  ;;  %v284_v5 = vpack.c.bf16 %v19_v1, %v16_v0  ;;  %v17_v7 = vld [vmem:[%s423_s0 + $0x10] sm:$0xff]  ;;  %v20_v8 = vld [vmem:[%s423_s0 + $0x28] sm:$0xff]  ;;  %281 = vmatprep.mubr.msk.f32.mxu1 %vm324_vm0, %v323_v4  ;;  %316 = vset.pattern.permute.xlu0 %v325_v9  ;;  %vm201_vm5 = vcmask 556032   ;;  %v327_v52 = vmov 1   ;;  %v328_v61 = vmov 2  }
   0x3   :  { %v286_v10 = vpack.c.bf16 %v18_v6, %v15_v2  ;;  %v299_v11 = vpack.c.bf16 %v20_v8, %v17_v7  ;;  %v22_v12 = vld [vmem:[%s423_s0 + $0x38] sm:$0xff]  ;;  %v25_v13 = vld [vmem:[%s423_s0 + $0x50] sm:$0xff]  ;;  %v24_v16 = vld [vmem:[%s423_s0 + $0x48] sm:$0xff]  ;;  %317 = vset.pattern.permute.xlu1 %v327_v52 }
   0x4   :  { %v21_v14 = vld [vmem:[%s423_s0 + $0x30] sm:$0xff]  ;;  %285 = vmatprep.subr.bf16.mxu0 %v284_v5  ;;  %v288_v15 = vpack.c.bf16 %v25_v13, %v22_v12  ;;  %v23_v17 = vld [vmem:[%s423_s0 + $0x40] sm:$0xff]  ;;  %v26_v18 = vld [vmem:[%s423_s0 + $0x58] sm:$0xff] }
   0x5   :  { %287 = vmatpush1.bf16.msra.mxu0 %v286_v10  ;;  %300 = vmatpush3.bf16.msra.mxu1 %v299_v11  ;;  %v290_v19 = vpack.c.bf16 %v24_v16, %v21_v14  ;;  %v302_v20 = vpack.c.bf16 %v26_v18, %v23_v17  ;;  %v28_v21 = vld [vmem:[%s423_s0 + $0x68] sm:$0xff]  ;;  %v31_v22 = vld [vmem:[%s423_s0 + $0x80] sm:$0x1f]  ;;  %v30_v25 = vld [vmem:[%s423_s0 + $0x78] sm:$0x1f] }
   0x6   :  { %289 = vmatprep.subr.bf16.mxu0 %v288_v15  ;;  %301 = vmatprep.subr.bf16.mxu1 %v322_v3  ;;  %v292_v23 = vpack.c.bf16 %v31_v22, %v28_v21  ;;  %v27_v24 = vld [vmem:[%s423_s0 + $0x60] sm:$0xff]  ;;  %v29_v26 = vld [vmem:[%s423_s0 + $0x70] sm:$0xff]  ;;  %vm293_vm3 = vmpackc.low %vm43_vm1, %vm326_vm2 }
   0x7   :  { %v32_v27 = vld [vmem:[%s423_s0 + $0x88] sm:$0x1f]  ;;  %v33_v28 = vld [vmem:[%s424_s2] sm:$0xff]  ;;  %v295_v29 = vpack.c.bf16 %v30_v25, %v27_v24  ;;  %s329_s0 = smov 1  }
   0x8   :  { %36 = vperm.xlu0 %316, %v33_v28   ;;  %v305_v30 = vpack.c.bf16 %v32_v27, %v29_v26  ;;  %v14_v31 = vld [vmem:[%s425_s1] sm:$0xff] }
   0x9   :  { %291 = vmatpush1.bf16.msra.mxu0 %v290_v19  ;;  %303 = vmatpush3.bf16.msra.mxu1 %v302_v20 }
   0xa   :  { %294 = vmatprep.subr.msk.bf16.mxu0 %vm293_vm3, %v292_v23  ;;  %304 = vmatprep.subr.bf16.mxu1 %v322_v3 }
   0xc   :  { %319 = vset.pattern.permute.xlu0 %v328_v61 }
   0xd   :  { %297 = vmatpush1.bf16.msk.msra.mxu0 %vm293_vm3, %v295_v29  ;;  %307 = vmatpush3.bf16.msk.msra.mxu1 %vm293_vm3, %v305_v30 }
  0x10   :  { %256 = vmatmul.mubr.msk.f32.vlgmr.msra.gmra.mrb[0].mxu0 %vm39_vm4, %v14_v31  ;;  %282 = vmatmul.mubr.msk.f32.vlgmr.msra.gmra.mrb[0].mxu1 %vm39_vm4, %v14_v31 }
  0x87   :  { %v37_v32 = vpop.permute.xlu0 %36 }
  0xe3   :  { %v119_v33 = vpop.f32.mrb[0].mxu0  ;;  %v190_v34 = vpop.f32.mrb[0].mxu1 }
  0xe4   :  { %v120_v35 = vadd.f32 %v119_v33, %v37_v32  ;;  %v121_v36 = vpop.f32.mrb[1].mxu0  ;;  %v191_v37 = vadd.f32 %v190_v34, %v37_v32  ;;  %v283_v38 = vpop.f32.mrb[1].mxu1 }
  0xe5   :  { %v122_v39 = vadd.f32 %v121_v36, %v37_v32 }
  0xe6   :  { %v259_v40 = vclamps-f32 %v120_v35, 1.0  ;;  %v261_v41 = vclamps-f32 %v191_v37, 1.0 }
  0xe7   :  { %v260_v42 = vclamps-f32 %v122_v39, 1.0 }
  0xe8   :  { %v202_v43 = vsel %vm201_vm5, %v261_v41, 0.0  ;;  %v206_v44 = vmul.f32 %v259_v40, %v259_v40  ;;  %v208_v45 = vmul.f32 %v261_v41, %v261_v41 }
  0xe9   :  { %v200_v46 = vadd.f32 %v260_v42, %v259_v40  ;;  %v207_v47 = vmul.f32 %v260_v42, %v260_v42 }
  0xea   :  { %v210_v48 = vsel %vm201_vm5, %v208_v45, 0.0 }
  0xeb   :  { %v203_v49 = vadd.f32 %v202_v43, %v200_v46  ;;  %v209_v50 = vadd.f32 %v207_v47, %v206_v44 }
  0xed   :  { %204 = vadd.xlane.f32.xlu0 %v203_v49  ;;  %v211_v51 = vadd.f32 %v210_v48, %v209_v50 }
  0xef   :  { %212 = vadd.xlane.f32.xlu1 %v211_v51 }
 0x17a   :  { %v205_v53 = vpop.xlane.xlu0 %204 }
 0x17b   :  { %v214_v54 = vmul.f32 0.0030864198, %v205_v53 }
 0x17c   :  { %v213_v55 = vpop.xlane.xlu1 %212 }
 0x17d   :  { %v216_v56 = vmul.f32 %v214_v54, %v214_v54  ;;  %v215_v57 = vmul.f32 0.0030864198, %v213_v55 }
 0x17f   :  { %v217_v58 = vsub.f32 %v215_v57, %v216_v56 }
 0x181   :  { %v218_v59 = vmax.f32 %v217_v58, 0.0 }
 0x183   :  { %v219_v60 = vadd.f32 1e-05, %v218_v59 }
 0x185   :  { %320 = vrsqrt.f32 %v219_v60 }
 0x18f   :  { %v321_v62 = vpop.eup %320 }
 0x190   :  { %v221_v63 = vmul.f32 %v321_v62, %v33_v28 }
 0x192   :  { %v222_v0 = vmul.f32 %v221_v63, %v214_v54 }
 0x194   :  { %224 = vrot.lane.b32.xlu1 %v222_v0, %s329_s0 }
 0x198   :  { %230 = vperm.xlu1 %317, %v221_v63  }
 0x19c   :  { %318 = vset.pattern.permute.xlu1 %v328_v61 }
 0x206   :  { %v225_v1 = vpop.permute.xlu1 %224 }
 0x207   :  { %v227_v2 = vsub.f32 %v33_v28, %v225_v1 }
 0x209   :  { %238 = vperm.xlu1 %318, %v227_v2  }
 0x217   :  { %v231_v3 = vpop.permute.xlu1 %230 }
 0x218   :  { %v233_v4 = vmul.f32 %v259_v40, %v231_v3  ;;  %v234_v5 = vmul.f32 %v260_v42, %v231_v3  ;;  %v235_v6 = vmul.f32 %v261_v41, %v231_v3 }
 0x288   :  { %v239_v7 = vpop.permute.xlu1 %238 }
 0x289   :  { %v241_v8 = vadd.f32 %v239_v7, %v233_v4  ;;  %v242_v9 = vadd.f32 %v239_v7, %v234_v5  ;;  %v243_v10 = vadd.f32 %v239_v7, %v235_v6 }
 0x28b   :  { %v244_v11 = vmax.f32 %v241_v8, 0.0  ;;  %v245_v12 = vmax.f32 %v242_v9, 0.0  ;;  %v246_v13 = vmax.f32 %v243_v10, 0.0 }
 0x28d   :  { %247 = vst [vmem:[%s426_s3] sm:$0xff] %v244_v11  ;;  %248 = vst [vmem:[%s426_s3 + $0x8] sm:$0xff] %v245_v12 }
 0x28e   :  { %249 = vst.msk [vmem:[%s426_s3 + $0x10] sm:$0xff] %vm201_vm5, %v246_v13 }

</bundles_post_ra>
